<compile_context>
chip_gen: v7x
topology: tpu7x:2x2x1
jax: 0.10.0
libtpu: 0.0.40
codegen_flags: <defaults>
</compile_context>

<pallas_src>
import functools
import math

import jax
import jax.numpy as jnp
from jax import lax
from jax.experimental import pallas as pl
from jax.experimental.pallas import tpu as pltpu


def _bert_attention_kernel(
    x_ref,              # (S, H)  hidden_states for this batch element
    mask_ref,           # (S, S)  attention mask (0 = masked out)
    wq_ref, bq_ref,     # (nh, H, hd), (nh, 1, hd)
    wk_ref, bk_ref,     # (nh, H, hd), (nh, 1, hd)
    wv_ref, bv_ref,     # (nh, H, hd), (nh, 1, hd)
    wo_ref,             # (nh, hd, H)  output projection, split along its input dim
    bo_ref,             # (1, H)
    gamma_ref,          # (1, H)
    beta_ref,           # (1, H)
    o_ref,              # (S, H)
    *, num_heads, scale, eps,
):
    x = x_ref[...].astype(jnp.float32)          # (S, H)
    mask = mask_ref[...]                        # (S, S) int32
    S, H = x.shape

    acc = jnp.zeros((S, H), jnp.float32)        # sum over heads of ctx_h @ Wo_h
    for h in range(num_heads):                  # static unroll over heads
        wq = wq_ref[h].astype(jnp.float32)      # (H, hd)
        wk = wk_ref[h].astype(jnp.float32)
        wv = wv_ref[h].astype(jnp.float32)
        qh = jnp.dot(x, wq, preferred_element_type=jnp.float32) + bq_ref[h].astype(jnp.float32)
        kh = jnp.dot(x, wk, preferred_element_type=jnp.float32) + bk_ref[h].astype(jnp.float32)
        vh = jnp.dot(x, wv, preferred_element_type=jnp.float32) + bv_ref[h].astype(jnp.float32)

        # scores = (qh @ kh^T) / sqrt(hd); rhs-transposed contraction on the MXU.
        s = lax.dot_general(qh, kh, (((1,), (1,)), ((), ())),
                            preferred_element_type=jnp.float32) * scale    # (S, S)
        s = jnp.where(mask == 0, jnp.float32(-1e9), s)

        # softmax over keys (numerically stable; matches nn.Softmax semantics)
        s_max = jnp.max(s, axis=-1, keepdims=True)
        p = jnp.exp(s - s_max)
        p = p / jnp.sum(p, axis=-1, keepdims=True)
        # TODO(synk): attention-probs dropout is a no-op in eval mode; not applied.

        ctx_h = jnp.dot(p, vh, preferred_element_type=jnp.float32)         # (S, hd)
        # Fold this head's slice of the output projection directly.
        acc = acc + jnp.dot(ctx_h, wo_ref[h].astype(jnp.float32),
                            preferred_element_type=jnp.float32)            # (S, H)

    y = acc + bo_ref[...].astype(jnp.float32)   # dense(context) + bias
    # TODO(synk): hidden dropout is a no-op in eval mode; not applied.
    z = y + x                                   # residual

    # LayerNorm (biased variance, like nn.LayerNorm)
    mean = jnp.mean(z, axis=-1, keepdims=True)
    zc = z - mean
    var = jnp.mean(zc * zc, axis=-1, keepdims=True)
    inv = lax.rsqrt(var + eps)
    out = zc * inv * gamma_ref[...].astype(jnp.float32) + beta_ref[...].astype(jnp.float32)
    o_ref[...] = out.astype(o_ref.dtype)


def bert_attention(hidden_states, attention_mask, wq, bq, wk, bk, wv, bv,
                   wo, bo, gamma, beta, *, num_heads, eps=1e-12):
    """Fused BertAttention forward.

    hidden_states: (B, S, H); attention_mask: (B, S, S) with 0 = masked.
    Linear weights in (in, out) layout, biases (H,).
    """
    B, S, H = hidden_states.shape
    assert H % num_heads == 0
    hd = H // num_heads
    scale = 1.0 / math.sqrt(hd)

    # Pre-split parameters per head so the kernel never splits the lane axis.
    wq_h = wq.reshape(H, num_heads, hd).transpose(1, 0, 2)   # (nh, H, hd)
    wk_h = wk.reshape(H, num_heads, hd).transpose(1, 0, 2)
    wv_h = wv.reshape(H, num_heads, hd).transpose(1, 0, 2)
    bq_h = bq.reshape(num_heads, 1, hd)
    bk_h = bk.reshape(num_heads, 1, hd)
    bv_h = bv.reshape(num_heads, 1, hd)
    wo_h = wo.reshape(num_heads, hd, H)                      # (nh, hd, H)
    bo2 = bo.reshape(1, H)
    gamma2 = gamma.reshape(1, H)
    beta2 = beta.reshape(1, H)
    mask = attention_mask.astype(jnp.int32)                  # (B, S, S)

    const3 = lambda b: (0, 0, 0)
    const2 = lambda b: (0, 0)

    grid_spec = pltpu.PrefetchScalarGridSpec(
        num_scalar_prefetch=0,
        grid=(B,),
        in_specs=[
            pl.BlockSpec((None, S, H), lambda b: (b, 0, 0)),   # hidden_states
            pl.BlockSpec((None, S, S), lambda b: (b, 0, 0)),   # attention mask
            pl.BlockSpec((num_heads, H, hd), const3),          # Wq (per head)
            pl.BlockSpec((num_heads, 1, hd), const3),          # bq
            pl.BlockSpec((num_heads, H, hd), const3),          # Wk
            pl.BlockSpec((num_heads, 1, hd), const3),          # bk
            pl.BlockSpec((num_heads, H, hd), const3),          # Wv
            pl.BlockSpec((num_heads, 1, hd), const3),          # bv
            pl.BlockSpec((num_heads, hd, H), const3),          # Wo (per head rows)
            pl.BlockSpec((1, H), const2),                      # bo
            pl.BlockSpec((1, H), const2),                      # gamma
            pl.BlockSpec((1, H), const2),                      # beta
        ],
        out_specs=pl.BlockSpec((None, S, H), lambda b: (b, 0, 0)),
    )

    out = pl.pallas_call(
        functools.partial(_bert_attention_kernel,
                          num_heads=num_heads, scale=scale, eps=eps),
        out_shape=jax.ShapeDtypeStruct((B, S, H), hidden_states.dtype),
        grid_spec=grid_spec,
        compiler_params=pltpu.CompilerParams(
            dimension_semantics=("parallel",)),   # both TCs on v7x
    )(hidden_states, mask, wq_h, bq_h, wk_h, bk_h, wv_h, bv_h,
      wo_h, bo2, gamma2, beta2)
    return out


def _reference(x, mask, wq, bq, wk, bk, wv, bv, wo, bo, gamma, beta,
               num_heads, eps):
    B, S, H = x.shape
    hd = H // num_heads

    def split(t):
        return t.reshape(B, S, num_heads, hd).transpose(0, 2, 1, 3)

    q = split(x @ wq + bq)
    k = split(x @ wk + bk)
    v = split(x @ wv + bv)
    s = jnp.einsum("bhqd,bhkd->bhqk", q, k) / math.sqrt(hd)
    s = jnp.where(mask[:, None, :, :] == 0, -1e9, s)
    p = jax.nn.softmax(s, axis=-1)
    ctx = jnp.einsum("bhqk,bhkd->bhqd", p, v)
    ctx = ctx.transpose(0, 2, 1, 3).reshape(B, S, H)
    y = ctx @ wo + bo
    z = y + x
    mean = z.mean(-1, keepdims=True)
    var = ((z - mean) ** 2).mean(-1, keepdims=True)
    return (z - mean) * lax.rsqrt(var + eps) * gamma + beta


if __name__ == "__main__":
    B, S, H, nh = 2, 8, 32, 4
    eps = 1e-12

    key = jax.random.PRNGKey(0)
    ks = jax.random.split(key, 9)
    x = jax.random.normal(ks[0], (B, S, H), jnp.float32)
    wq = 0.02 * jax.random.normal(ks[1], (H, H), jnp.float32)
    wk = 0.02 * jax.random.normal(ks[2], (H, H), jnp.float32)
    wv = 0.02 * jax.random.normal(ks[3], (H, H), jnp.float32)
    wo = 0.02 * jax.random.normal(ks[4], (H, H), jnp.float32)
    bq = 0.02 * jax.random.normal(ks[5], (H,), jnp.float32)
    bk = 0.02 * jax.random.normal(ks[6], (H,), jnp.float32)
    bv = 0.02 * jax.random.normal(ks[7], (H,), jnp.float32)
    bo = 0.02 * jax.random.normal(ks[8], (H,), jnp.float32)
    gamma = jnp.ones((H,), jnp.float32)
    beta = jnp.zeros((H,), jnp.float32)

    # Key-padding mask: batch 0 attends to all 8 keys, batch 1 only first 5.
    lens = jnp.array([8, 5], dtype=jnp.int32)
    key_valid = (jnp.arange(S)[None, :] < lens[:, None]).astype(jnp.int32)  # (B, S)
    attention_mask = jnp.broadcast_to(key_valid[:, None, :], (B, S, S))     # (B, S, S)

    out = bert_attention(x, attention_mask, wq, bq, wk, bk, wv, bv,
                         wo, bo, gamma, beta, num_heads=nh, eps=eps)
    out = jax.block_until_ready(out)

    ref = _reference(x, attention_mask, wq, bq, wk, bk, wv, bv,
                     wo, bo, gamma, beta, nh, eps)
    assert out.shape == (B, S, H)
    assert jnp.allclose(out, ref, atol=2e-3, rtol=2e-3), (
        f"mismatch vs reference, max abs diff = {jnp.max(jnp.abs(out - ref))}")

    print("KERNEL_OK")
</pallas_src>

<mosaic_0001>
module attributes {stable_mosaic.version = 11 : i64} {
  func.func @_bert_attention_kernel(%arg0: i32, %arg1: memref<1x8x32xf32, #tpu.memory_space<vmem>>, %arg2: memref<1x8x8xi32, #tpu.memory_space<vmem>>, %arg3: memref<4x32x8xf32, #tpu.memory_space<vmem>>, %arg4: memref<4x1x8xf32, #tpu.memory_space<vmem>>, %arg5: memref<4x32x8xf32, #tpu.memory_space<vmem>>, %arg6: memref<4x1x8xf32, #tpu.memory_space<vmem>>, %arg7: memref<4x32x8xf32, #tpu.memory_space<vmem>>, %arg8: memref<4x1x8xf32, #tpu.memory_space<vmem>>, %arg9: memref<4x8x32xf32, #tpu.memory_space<vmem>>, %arg10: memref<1x32xf32, #tpu.memory_space<vmem>>, %arg11: memref<1x32xf32, #tpu.memory_space<vmem>>, %arg12: memref<1x32xf32, #tpu.memory_space<vmem>>, %arg13: memref<1x8x32xf32, #tpu.memory_space<vmem>>) attributes {dimension_semantics = [#tpu.dimension_semantics<parallel>], iteration_bounds = array<i64: 2>, scalar_prefetch = 0 : i64, scratch_operands = 0 : i64, tpu.core_type = #tpu.core_type<tc>, window_params = [{transform_indices = @transform_0, window_bounds = array<i64: 1, 8, 32>}, {transform_indices = @transform_1, window_bounds = array<i64: 1, 8, 8>}, {pipeline_mode = #tpu.pipeline_mode<synchronous>, transform_indices = @transform_2, window_bounds = array<i64: 4, 32, 8>}, {pipeline_mode = #tpu.pipeline_mode<synchronous>, transform_indices = @transform_3, window_bounds = array<i64: 4, 1, 8>}, {pipeline_mode = #tpu.pipeline_mode<synchronous>, transform_indices = @transform_4, window_bounds = array<i64: 4, 32, 8>}, {pipeline_mode = #tpu.pipeline_mode<synchronous>, transform_indices = @transform_5, window_bounds = array<i64: 4, 1, 8>}, {pipeline_mode = #tpu.pipeline_mode<synchronous>, transform_indices = @transform_6, window_bounds = array<i64: 4, 32, 8>}, {pipeline_mode = #tpu.pipeline_mode<synchronous>, transform_indices = @transform_7, window_bounds = array<i64: 4, 1, 8>}, {pipeline_mode = #tpu.pipeline_mode<synchronous>, transform_indices = @transform_8, window_bounds = array<i64: 4, 8, 32>}, {pipeline_mode = #tpu.pipeline_mode<synchronous>, transform_indices = @transform_9, window_bounds = array<i64: 1, 32>}, {pipeline_mode = #tpu.pipeline_mode<synchronous>, transform_indices = @transform_10, window_bounds = array<i64: 1, 32>}, {pipeline_mode = #tpu.pipeline_mode<synchronous>, transform_indices = @transform_11, window_bounds = array<i64: 1, 32>}, {transform_indices = @transform_12, window_bounds = array<i64: 1, 8, 32>}]} {
    %c0 = arith.constant 0 : index
    %c0_0 = arith.constant 0 : index
    %c0_1 = arith.constant 0 : index
    %0 = vector.load %arg1[%c0, %c0_0, %c0_1] : memref<1x8x32xf32, #tpu.memory_space<vmem>>, vector<1x8x32xf32>
    %1 = vector.shape_cast %0 : vector<1x8x32xf32> to vector<8x32xf32>
    %c0_2 = arith.constant 0 : index
    %c0_3 = arith.constant 0 : index
    %c0_4 = arith.constant 0 : index
    %2 = vector.load %arg2[%c0_2, %c0_3, %c0_4] : memref<1x8x8xi32, #tpu.memory_space<vmem>>, vector<1x8x8xi32>
    %3 = vector.shape_cast %2 : vector<1x8x8xi32> to vector<8x8xi32>
    %cst = arith.constant 0.000000e+00 : f32
    %4 = vector.broadcast %cst : f32 to vector<8x32xf32>
    %c0_5 = arith.constant 0 : index
    %c0_6 = arith.constant 0 : index
    %c0_7 = arith.constant 0 : index
    %5 = vector.load %arg3[%c0_5, %c0_6, %c0_7] : memref<4x32x8xf32, #tpu.memory_space<vmem>>, vector<1x32x8xf32>
    %6 = vector.shape_cast %5 : vector<1x32x8xf32> to vector<32x8xf32>
    %c0_8 = arith.constant 0 : index
    %c0_9 = arith.constant 0 : index
    %c0_10 = arith.constant 0 : index
    %7 = vector.load %arg5[%c0_8, %c0_9, %c0_10] : memref<4x32x8xf32, #tpu.memory_space<vmem>>, vector<1x32x8xf32>
    %8 = vector.shape_cast %7 : vector<1x32x8xf32> to vector<32x8xf32>
    %c0_11 = arith.constant 0 : index
    %c0_12 = arith.constant 0 : index
    %c0_13 = arith.constant 0 : index
    %9 = vector.load %arg7[%c0_11, %c0_12, %c0_13] : memref<4x32x8xf32, #tpu.memory_space<vmem>>, vector<1x32x8xf32>
    %10 = vector.shape_cast %9 : vector<1x32x8xf32> to vector<32x8xf32>
    %cst_14 = arith.constant dense<0.000000e+00> : vector<8x8xf32>
    %11 = tpu.matmul %1, %6, %cst_14 {dimension_numbers = #tpu.dot_dimension_numbers<[1], [0], [0], [1], [0, 0, 1, 1], [], []>} : vector<8x32xf32>, vector<32x8xf32>, vector<8x8xf32> -> vector<8x8xf32>
    %c0_15 = arith.constant 0 : index
    %c0_16 = arith.constant 0 : index
    %c0_17 = arith.constant 0 : index
    %12 = vector.load %arg4[%c0_15, %c0_16, %c0_17] : memref<4x1x8xf32, #tpu.memory_space<vmem>>, vector<1x1x8xf32>
    %13 = vector.shape_cast %12 : vector<1x1x8xf32> to vector<1x8xf32>
    %14 = vector.broadcast %13 : vector<1x8xf32> to vector<8x8xf32>
    %15 = arith.addf %11, %14 : vector<8x8xf32>
    %cst_18 = arith.constant dense<0.000000e+00> : vector<8x8xf32>
    %16 = tpu.matmul %1, %8, %cst_18 {dimension_numbers = #tpu.dot_dimension_numbers<[1], [0], [0], [1], [0, 0, 1, 1], [], []>} : vector<8x32xf32>, vector<32x8xf32>, vector<8x8xf32> -> vector<8x8xf32>
    %c0_19 = arith.constant 0 : index
    %c0_20 = arith.constant 0 : index
    %c0_21 = arith.constant 0 : index
    %17 = vector.load %arg6[%c0_19, %c0_20, %c0_21] : memref<4x1x8xf32, #tpu.memory_space<vmem>>, vector<1x1x8xf32>
    %18 = vector.shape_cast %17 : vector<1x1x8xf32> to vector<1x8xf32>
    %19 = vector.broadcast %18 : vector<1x8xf32> to vector<8x8xf32>
    %20 = arith.addf %16, %19 : vector<8x8xf32>
    %cst_22 = arith.constant dense<0.000000e+00> : vector<8x8xf32>
    %21 = tpu.matmul %1, %10, %cst_22 {dimension_numbers = #tpu.dot_dimension_numbers<[1], [0], [0], [1], [0, 0, 1, 1], [], []>} : vector<8x32xf32>, vector<32x8xf32>, vector<8x8xf32> -> vector<8x8xf32>
    %c0_23 = arith.constant 0 : index
    %c0_24 = arith.constant 0 : index
    %c0_25 = arith.constant 0 : index
    %22 = vector.load %arg8[%c0_23, %c0_24, %c0_25] : memref<4x1x8xf32, #tpu.memory_space<vmem>>, vector<1x1x8xf32>
    %23 = vector.shape_cast %22 : vector<1x1x8xf32> to vector<1x8xf32>
    %24 = vector.broadcast %23 : vector<1x8xf32> to vector<8x8xf32>
    %25 = arith.addf %21, %24 : vector<8x8xf32>
    %cst_26 = arith.constant dense<0.000000e+00> : vector<8x8xf32>
    %26 = tpu.matmul %15, %20, %cst_26 {dimension_numbers = #tpu.dot_dimension_numbers<[1], [1], [0], [0], [0, 0, 1, 0], [], []>} : vector<8x8xf32>, vector<8x8xf32>, vector<8x8xf32> -> vector<8x8xf32>
    %cst_27 = arith.constant 0.353553385 : f32
    %27 = vector.broadcast %cst_27 : f32 to vector<8x8xf32>
    %28 = arith.mulf %26, %27 : vector<8x8xf32>
    %c0_i32 = arith.constant 0 : i32
    %29 = vector.broadcast %c0_i32 : i32 to vector<8x8xi32>
    %30 = arith.cmpi eq, %3, %29 : vector<8x8xi32>
    %cst_28 = arith.constant -1.000000e+09 : f32
    %31 = vector.broadcast %cst_28 : f32 to vector<8x8xf32>
    %32 = arith.select %30, %31, %28 : vector<8x8xi1>, vector<8x8xf32>
    %cst_29 = arith.constant dense<0xFF800000> : vector<8xf32>
    %33 = vector.multi_reduction <maximumf>, %32, %cst_29 [1] : vector<8x8xf32> to vector<8xf32>
    %34 = vector.shape_cast %33 : vector<8xf32> to vector<8x1xf32>
    %35 = vector.broadcast %34 : vector<8x1xf32> to vector<8x8xf32>
    %36 = arith.subf %32, %35 : vector<8x8xf32>
    %37 = math.exp %36 : vector<8x8xf32>
    %cst_30 = arith.constant dense<0.000000e+00> : vector<8xf32>
    %38 = vector.multi_reduction <add>, %37, %cst_30 [1] : vector<8x8xf32> to vector<8xf32>
    %39 = vector.shape_cast %38 : vector<8xf32> to vector<8x1xf32>
    %40 = vector.broadcast %39 : vector<8x1xf32> to vector<8x8xf32>
    %41 = arith.divf %37, %40 : vector<8x8xf32>
    %cst_31 = arith.constant dense<0.000000e+00> : vector<8x8xf32>
    %42 = tpu.matmul %41, %25, %cst_31 {dimension_numbers = #tpu.dot_dimension_numbers<[1], [0], [0], [1], [0, 0, 1, 1], [], []>} : vector<8x8xf32>, vector<8x8xf32>, vector<8x8xf32> -> vector<8x8xf32>
    %c0_32 = arith.constant 0 : index
    %c0_33 = arith.constant 0 : index
    %c0_34 = arith.constant 0 : index
    %43 = vector.load %arg9[%c0_32, %c0_33, %c0_34] : memref<4x8x32xf32, #tpu.memory_space<vmem>>, vector<1x8x32xf32>
    %44 = vector.shape_cast %43 : vector<1x8x32xf32> to vector<8x32xf32>
    %cst_35 = arith.constant dense<0.000000e+00> : vector<8x32xf32>
    %45 = tpu.matmul %42, %44, %cst_35 {dimension_numbers = #tpu.dot_dimension_numbers<[1], [0], [0], [1], [0, 0, 1, 1], [], []>} : vector<8x8xf32>, vector<8x32xf32>, vector<8x32xf32> -> vector<8x32xf32>
    %46 = arith.addf %4, %45 : vector<8x32xf32>
    %c1 = arith.constant 1 : index
    %c0_36 = arith.constant 0 : index
    %c0_37 = arith.constant 0 : index
    %47 = vector.load %arg3[%c1, %c0_36, %c0_37] : memref<4x32x8xf32, #tpu.memory_space<vmem>>, vector<1x32x8xf32>
    %48 = vector.shape_cast %47 : vector<1x32x8xf32> to vector<32x8xf32>
    %c1_38 = arith.constant 1 : index
    %c0_39 = arith.constant 0 : index
    %c0_40 = arith.constant 0 : index
    %49 = vector.load %arg5[%c1_38, %c0_39, %c0_40] : memref<4x32x8xf32, #tpu.memory_space<vmem>>, vector<1x32x8xf32>
    %50 = vector.shape_cast %49 : vector<1x32x8xf32> to vector<32x8xf32>
    %c1_41 = arith.constant 1 : index
    %c0_42 = arith.constant 0 : index
    %c0_43 = arith.constant 0 : index
    %51 = vector.load %arg7[%c1_41, %c0_42, %c0_43] : memref<4x32x8xf32, #tpu.memory_space<vmem>>, vector<1x32x8xf32>
    %52 = vector.shape_cast %51 : vector<1x32x8xf32> to vector<32x8xf32>
    %cst_44 = arith.constant dense<0.000000e+00> : vector<8x8xf32>
    %53 = tpu.matmul %1, %48, %cst_44 {dimension_numbers = #tpu.dot_dimension_numbers<[1], [0], [0], [1], [0, 0, 1, 1], [], []>} : vector<8x32xf32>, vector<32x8xf32>, vector<8x8xf32> -> vector<8x8xf32>
    %c1_45 = arith.constant 1 : index
    %c0_46 = arith.constant 0 : index
    %c0_47 = arith.constant 0 : index
    %54 = vector.load %arg4[%c1_45, %c0_46, %c0_47] : memref<4x1x8xf32, #tpu.memory_space<vmem>>, vector<1x1x8xf32>
    %55 = vector.shape_cast %54 : vector<1x1x8xf32> to vector<1x8xf32>
    %56 = vector.broadcast %55 : vector<1x8xf32> to vector<8x8xf32>
    %57 = arith.addf %53, %56 : vector<8x8xf32>
    %cst_48 = arith.constant dense<0.000000e+00> : vector<8x8xf32>
    %58 = tpu.matmul %1, %50, %cst_48 {dimension_numbers = #tpu.dot_dimension_numbers<[1], [0], [0], [1], [0, 0, 1, 1], [], []>} : vector<8x32xf32>, vector<32x8xf32>, vector<8x8xf32> -> vector<8x8xf32>
    %c1_49 = arith.constant 1 : index
    %c0_50 = arith.constant 0 : index
    %c0_51 = arith.constant 0 : index
    %59 = vector.load %arg6[%c1_49, %c0_50, %c0_51] : memref<4x1x8xf32, #tpu.memory_space<vmem>>, vector<1x1x8xf32>
    %60 = vector.shape_cast %59 : vector<1x1x8xf32> to vector<1x8xf32>
    %61 = vector.broadcast %60 : vector<1x8xf32> to vector<8x8xf32>
    %62 = arith.addf %58, %61 : vector<8x8xf32>
    %cst_52 = arith.constant dense<0.000000e+00> : vector<8x8xf32>
    %63 = tpu.matmul %1, %52, %cst_52 {dimension_numbers = #tpu.dot_dimension_numbers<[1], [0], [0], [1], [0, 0, 1, 1], [], []>} : vector<8x32xf32>, vector<32x8xf32>, vector<8x8xf32> -> vector<8x8xf32>
    %c1_53 = arith.constant 1 : index
    %c0_54 = arith.constant 0 : index
    %c0_55 = arith.constant 0 : index
    %64 = vector.load %arg8[%c1_53, %c0_54, %c0_55] : memref<4x1x8xf32, #tpu.memory_space<vmem>>, vector<1x1x8xf32>
    %65 = vector.shape_cast %64 : vector<1x1x8xf32> to vector<1x8xf32>
    %66 = vector.broadcast %65 : vector<1x8xf32> to vector<8x8xf32>
    %67 = arith.addf %63, %66 : vector<8x8xf32>
    %cst_56 = arith.constant dense<0.000000e+00> : vector<8x8xf32>
    %68 = tpu.matmul %57, %62, %cst_56 {dimension_numbers = #tpu.dot_dimension_numbers<[1], [1], [0], [0], [0, 0, 1, 0], [], []>} : vector<8x8xf32>, vector<8x8xf32>, vector<8x8xf32> -> vector<8x8xf32>
    %cst_57 = arith.constant 0.353553385 : f32
    %69 = vector.broadcast %cst_57 : f32 to vector<8x8xf32>
    %70 = arith.mulf %68, %69 : vector<8x8xf32>
    %c0_i32_58 = arith.constant 0 : i32
    %71 = vector.broadcast %c0_i32_58 : i32 to vector<8x8xi32>
    %72 = arith.cmpi eq, %3, %71 : vector<8x8xi32>
    %cst_59 = arith.constant -1.000000e+09 : f32
    %73 = vector.broadcast %cst_59 : f32 to vector<8x8xf32>
    %74 = arith.select %72, %73, %70 : vector<8x8xi1>, vector<8x8xf32>
    %cst_60 = arith.constant dense<0xFF800000> : vector<8xf32>
    %75 = vector.multi_reduction <maximumf>, %74, %cst_60 [1] : vector<8x8xf32> to vector<8xf32>
    %76 = vector.shape_cast %75 : vector<8xf32> to vector<8x1xf32>
    %77 = vector.broadcast %76 : vector<8x1xf32> to vector<8x8xf32>
    %78 = arith.subf %74, %77 : vector<8x8xf32>
    %79 = math.exp %78 : vector<8x8xf32>
    %cst_61 = arith.constant dense<0.000000e+00> : vector<8xf32>
    %80 = vector.multi_reduction <add>, %79, %cst_61 [1] : vector<8x8xf32> to vector<8xf32>
    %81 = vector.shape_cast %80 : vector<8xf32> to vector<8x1xf32>
    %82 = vector.broadcast %81 : vector<8x1xf32> to vector<8x8xf32>
    %83 = arith.divf %79, %82 : vector<8x8xf32>
    %cst_62 = arith.constant dense<0.000000e+00> : vector<8x8xf32>
    %84 = tpu.matmul %83, %67, %cst_62 {dimension_numbers = #tpu.dot_dimension_numbers<[1], [0], [0], [1], [0, 0, 1, 1], [], []>} : vector<8x8xf32>, vector<8x8xf32>, vector<8x8xf32> -> vector<8x8xf32>
    %c1_63 = arith.constant 1 : index
    %c0_64 = arith.constant 0 : index
    %c0_65 = arith.constant 0 : index
    %85 = vector.load %arg9[%c1_63, %c0_64, %c0_65] : memref<4x8x32xf32, #tpu.memory_space<vmem>>, vector<1x8x32xf32>
    %86 = vector.shape_cast %85 : vector<1x8x32xf32> to vector<8x32xf32>
    %cst_66 = arith.constant dense<0.000000e+00> : vector<8x32xf32>
    %87 = tpu.matmul %84, %86, %cst_66 {dimension_numbers = #tpu.dot_dimension_numbers<[1], [0], [0], [1], [0, 0, 1, 1], [], []>} : vector<8x8xf32>, vector<8x32xf32>, vector<8x32xf32> -> vector<8x32xf32>
    %88 = arith.addf %46, %87 : vector<8x32xf32>
    %c2 = arith.constant 2 : index
    %c0_67 = arith.constant 0 : index
    %c0_68 = arith.constant 0 : index
    %89 = vector.load %arg3[%c2, %c0_67, %c0_68] : memref<4x32x8xf32, #tpu.memory_space<vmem>>, vector<1x32x8xf32>
    %90 = vector.shape_cast %89 : vector<1x32x8xf32> to vector<32x8xf32>
    %c2_69 = arith.constant 2 : index
    %c0_70 = arith.constant 0 : index
    %c0_71 = arith.constant 0 : index
    %91 = vector.load %arg5[%c2_69, %c0_70, %c0_71] : memref<4x32x8xf32, #tpu.memory_space<vmem>>, vector<1x32x8xf32>
    %92 = vector.shape_cast %91 : vector<1x32x8xf32> to vector<32x8xf32>
    %c2_72 = arith.constant 2 : index
    %c0_73 = arith.constant 0 : index
    %c0_74 = arith.constant 0 : index
    %93 = vector.load %arg7[%c2_72, %c0_73, %c0_74] : memref<4x32x8xf32, #tpu.memory_space<vmem>>, vector<1x32x8xf32>
    %94 = vector.shape_cast %93 : vector<1x32x8xf32> to vector<32x8xf32>
    %cst_75 = arith.constant dense<0.000000e+00> : vector<8x8xf32>
    %95 = tpu.matmul %1, %90, %cst_75 {dimension_numbers = #tpu.dot_dimension_numbers<[1], [0], [0], [1], [0, 0, 1, 1], [], []>} : vector<8x32xf32>, vector<32x8xf32>, vector<8x8xf32> -> vector<8x8xf32>
    %c2_76 = arith.constant 2 : index
    %c0_77 = arith.constant 0 : index
    %c0_78 = arith.constant 0 : index
    %96 = vector.load %arg4[%c2_76, %c0_77, %c0_78] : memref<4x1x8xf32, #tpu.memory_space<vmem>>, vector<1x1x8xf32>
    %97 = vector.shape_cast %96 : vector<1x1x8xf32> to vector<1x8xf32>
    %98 = vector.broadcast %97 : vector<1x8xf32> to vector<8x8xf32>
    %99 = arith.addf %95, %98 : vector<8x8xf32>
    %cst_79 = arith.constant dense<0.000000e+00> : vector<8x8xf32>
    %100 = tpu.matmul %1, %92, %cst_79 {dimension_numbers = #tpu.dot_dimension_numbers<[1], [0], [0], [1], [0, 0, 1, 1], [], []>} : vector<8x32xf32>, vector<32x8xf32>, vector<8x8xf32> -> vector<8x8xf32>
    %c2_80 = arith.constant 2 : index
    %c0_81 = arith.constant 0 : index
    %c0_82 = arith.constant 0 : index
    %101 = vector.load %arg6[%c2_80, %c0_81, %c0_82] : memref<4x1x8xf32, #tpu.memory_space<vmem>>, vector<1x1x8xf32>
    %102 = vector.shape_cast %101 : vector<1x1x8xf32> to vector<1x8xf32>
    %103 = vector.broadcast %102 : vector<1x8xf32> to vector<8x8xf32>
    %104 = arith.addf %100, %103 : vector<8x8xf32>
    %cst_83 = arith.constant dense<0.000000e+00> : vector<8x8xf32>
    %105 = tpu.matmul %1, %94, %cst_83 {dimension_numbers = #tpu.dot_dimension_numbers<[1], [0], [0], [1], [0, 0, 1, 1], [], []>} : vector<8x32xf32>, vector<32x8xf32>, vector<8x8xf32> -> vector<8x8xf32>
    %c2_84 = arith.constant 2 : index
    %c0_85 = arith.constant 0 : index
    %c0_86 = arith.constant 0 : index
    %106 = vector.load %arg8[%c2_84, %c0_85, %c0_86] : memref<4x1x8xf32, #tpu.memory_space<vmem>>, vector<1x1x8xf32>
    %107 = vector.shape_cast %106 : vector<1x1x8xf32> to vector<1x8xf32>
    %108 = vector.broadcast %107 : vector<1x8xf32> to vector<8x8xf32>
    %109 = arith.addf %105, %108 : vector<8x8xf32>
    %cst_87 = arith.constant dense<0.000000e+00> : vector<8x8xf32>
    %110 = tpu.matmul %99, %104, %cst_87 {dimension_numbers = #tpu.dot_dimension_numbers<[1], [1], [0], [0], [0, 0, 1, 0], [], []>} : vector<8x8xf32>, vector<8x8xf32>, vector<8x8xf32> -> vector<8x8xf32>
    %cst_88 = arith.constant 0.353553385 : f32
    %111 = vector.broadcast %cst_88 : f32 to vector<8x8xf32>
    %112 = arith.mulf %110, %111 : vector<8x8xf32>
    %c0_i32_89 = arith.constant 0 : i32
    %113 = vector.broadcast %c0_i32_89 : i32 to vector<8x8xi32>
    %114 = arith.cmpi eq, %3, %113 : vector<8x8xi32>
    %cst_90 = arith.constant -1.000000e+09 : f32
    %115 = vector.broadcast %cst_90 : f32 to vector<8x8xf32>
    %116 = arith.select %114, %115, %112 : vector<8x8xi1>, vector<8x8xf32>
    %cst_91 = arith.constant dense<0xFF800000> : vector<8xf32>
    %117 = vector.multi_reduction <maximumf>, %116, %cst_91 [1] : vector<8x8xf32> to vector<8xf32>
    %118 = vector.shape_cast %117 : vector<8xf32> to vector<8x1xf32>
    %119 = vector.broadcast %118 : vector<8x1xf32> to vector<8x8xf32>
    %120 = arith.subf %116, %119 : vector<8x8xf32>
    %121 = math.exp %120 : vector<8x8xf32>
    %cst_92 = arith.constant dense<0.000000e+00> : vector<8xf32>
    %122 = vector.multi_reduction <add>, %121, %cst_92 [1] : vector<8x8xf32> to vector<8xf32>
    %123 = vector.shape_cast %122 : vector<8xf32> to vector<8x1xf32>
    %124 = vector.broadcast %123 : vector<8x1xf32> to vector<8x8xf32>
    %125 = arith.divf %121, %124 : vector<8x8xf32>
    %cst_93 = arith.constant dense<0.000000e+00> : vector<8x8xf32>
    %126 = tpu.matmul %125, %109, %cst_93 {dimension_numbers = #tpu.dot_dimension_numbers<[1], [0], [0], [1], [0, 0, 1, 1], [], []>} : vector<8x8xf32>, vector<8x8xf32>, vector<8x8xf32> -> vector<8x8xf32>
    %c2_94 = arith.constant 2 : index
    %c0_95 = arith.constant 0 : index
    %c0_96 = arith.constant 0 : index
    %127 = vector.load %arg9[%c2_94, %c0_95, %c0_96] : memref<4x8x32xf32, #tpu.memory_space<vmem>>, vector<1x8x32xf32>
    %128 = vector.shape_cast %127 : vector<1x8x32xf32> to vector<8x32xf32>
    %cst_97 = arith.constant dense<0.000000e+00> : vector<8x32xf32>
    %129 = tpu.matmul %126, %128, %cst_97 {dimension_numbers = #tpu.dot_dimension_numbers<[1], [0], [0], [1], [0, 0, 1, 1], [], []>} : vector<8x8xf32>, vector<8x32xf32>, vector<8x32xf32> -> vector<8x32xf32>
    %130 = arith.addf %88, %129 : vector<8x32xf32>
    %c3 = arith.constant 3 : index
    %c0_98 = arith.constant 0 : index
    %c0_99 = arith.constant 0 : index
    %131 = vector.load %arg3[%c3, %c0_98, %c0_99] : memref<4x32x8xf32, #tpu.memory_space<vmem>>, vector<1x32x8xf32>
    %132 = vector.shape_cast %131 : vector<1x32x8xf32> to vector<32x8xf32>
    %c3_100 = arith.constant 3 : index
    %c0_101 = arith.constant 0 : index
    %c0_102 = arith.constant 0 : index
    %133 = vector.load %arg5[%c3_100, %c0_101, %c0_102] : memref<4x32x8xf32, #tpu.memory_space<vmem>>, vector<1x32x8xf32>
    %134 = vector.shape_cast %133 : vector<1x32x8xf32> to vector<32x8xf32>
    %c3_103 = arith.constant 3 : index
    %c0_104 = arith.constant 0 : index
    %c0_105 = arith.constant 0 : index
    %135 = vector.load %arg7[%c3_103, %c0_104, %c0_105] : memref<4x32x8xf32, #tpu.memory_space<vmem>>, vector<1x32x8xf32>
    %136 = vector.shape_cast %135 : vector<1x32x8xf32> to vector<32x8xf32>
    %cst_106 = arith.constant dense<0.000000e+00> : vector<8x8xf32>
    %137 = tpu.matmul %1, %132, %cst_106 {dimension_numbers = #tpu.dot_dimension_numbers<[1], [0], [0], [1], [0, 0, 1, 1], [], []>} : vector<8x32xf32>, vector<32x8xf32>, vector<8x8xf32> -> vector<8x8xf32>
    %c3_107 = arith.constant 3 : index
    %c0_108 = arith.constant 0 : index
    %c0_109 = arith.constant 0 : index
    %138 = vector.load %arg4[%c3_107, %c0_108, %c0_109] : memref<4x1x8xf32, #tpu.memory_space<vmem>>, vector<1x1x8xf32>
    %139 = vector.shape_cast %138 : vector<1x1x8xf32> to vector<1x8xf32>
    %140 = vector.broadcast %139 : vector<1x8xf32> to vector<8x8xf32>
    %141 = arith.addf %137, %140 : vector<8x8xf32>
    %cst_110 = arith.constant dense<0.000000e+00> : vector<8x8xf32>
    %142 = tpu.matmul %1, %134, %cst_110 {dimension_numbers = #tpu.dot_dimension_numbers<[1], [0], [0], [1], [0, 0, 1, 1], [], []>} : vector<8x32xf32>, vector<32x8xf32>, vector<8x8xf32> -> vector<8x8xf32>
    %c3_111 = arith.constant 3 : index
    %c0_112 = arith.constant 0 : index
    %c0_113 = arith.constant 0 : index
    %143 = vector.load %arg6[%c3_111, %c0_112, %c0_113] : memref<4x1x8xf32, #tpu.memory_space<vmem>>, vector<1x1x8xf32>
    %144 = vector.shape_cast %143 : vector<1x1x8xf32> to vector<1x8xf32>
    %145 = vector.broadcast %144 : vector<1x8xf32> to vector<8x8xf32>
    %146 = arith.addf %142, %145 : vector<8x8xf32>
    %cst_114 = arith.constant dense<0.000000e+00> : vector<8x8xf32>
    %147 = tpu.matmul %1, %136, %cst_114 {dimension_numbers = #tpu.dot_dimension_numbers<[1], [0], [0], [1], [0, 0, 1, 1], [], []>} : vector<8x32xf32>, vector<32x8xf32>, vector<8x8xf32> -> vector<8x8xf32>
    %c3_115 = arith.constant 3 : index
    %c0_116 = arith.constant 0 : index
    %c0_117 = arith.constant 0 : index
    %148 = vector.load %arg8[%c3_115, %c0_116, %c0_117] : memref<4x1x8xf32, #tpu.memory_space<vmem>>, vector<1x1x8xf32>
    %149 = vector.shape_cast %148 : vector<1x1x8xf32> to vector<1x8xf32>
    %150 = vector.broadcast %149 : vector<1x8xf32> to vector<8x8xf32>
    %151 = arith.addf %147, %150 : vector<8x8xf32>
    %cst_118 = arith.constant dense<0.000000e+00> : vector<8x8xf32>
    %152 = tpu.matmul %141, %146, %cst_118 {dimension_numbers = #tpu.dot_dimension_numbers<[1], [1], [0], [0], [0, 0, 1, 0], [], []>} : vector<8x8xf32>, vector<8x8xf32>, vector<8x8xf32> -> vector<8x8xf32>
    %cst_119 = arith.constant 0.353553385 : f32
    %153 = vector.broadcast %cst_119 : f32 to vector<8x8xf32>
    %154 = arith.mulf %152, %153 : vector<8x8xf32>
    %c0_i32_120 = arith.constant 0 : i32
    %155 = vector.broadcast %c0_i32_120 : i32 to vector<8x8xi32>
    %156 = arith.cmpi eq, %3, %155 : vector<8x8xi32>
    %cst_121 = arith.constant -1.000000e+09 : f32
    %157 = vector.broadcast %cst_121 : f32 to vector<8x8xf32>
    %158 = arith.select %156, %157, %154 : vector<8x8xi1>, vector<8x8xf32>
    %cst_122 = arith.constant dense<0xFF800000> : vector<8xf32>
    %159 = vector.multi_reduction <maximumf>, %158, %cst_122 [1] : vector<8x8xf32> to vector<8xf32>
    %160 = vector.shape_cast %159 : vector<8xf32> to vector<8x1xf32>
    %161 = vector.broadcast %160 : vector<8x1xf32> to vector<8x8xf32>
    %162 = arith.subf %158, %161 : vector<8x8xf32>
    %163 = math.exp %162 : vector<8x8xf32>
    %cst_123 = arith.constant dense<0.000000e+00> : vector<8xf32>
    %164 = vector.multi_reduction <add>, %163, %cst_123 [1] : vector<8x8xf32> to vector<8xf32>
    %165 = vector.shape_cast %164 : vector<8xf32> to vector<8x1xf32>
    %166 = vector.broadcast %165 : vector<8x1xf32> to vector<8x8xf32>
    %167 = arith.divf %163, %166 : vector<8x8xf32>
    %cst_124 = arith.constant dense<0.000000e+00> : vector<8x8xf32>
    %168 = tpu.matmul %167, %151, %cst_124 {dimension_numbers = #tpu.dot_dimension_numbers<[1], [0], [0], [1], [0, 0, 1, 1], [], []>} : vector<8x8xf32>, vector<8x8xf32>, vector<8x8xf32> -> vector<8x8xf32>
    %c3_125 = arith.constant 3 : index
    %c0_126 = arith.constant 0 : index
    %c0_127 = arith.constant 0 : index
    %169 = vector.load %arg9[%c3_125, %c0_126, %c0_127] : memref<4x8x32xf32, #tpu.memory_space<vmem>>, vector<1x8x32xf32>
    %170 = vector.shape_cast %169 : vector<1x8x32xf32> to vector<8x32xf32>
    %cst_128 = arith.constant dense<0.000000e+00> : vector<8x32xf32>
    %171 = tpu.matmul %168, %170, %cst_128 {dimension_numbers = #tpu.dot_dimension_numbers<[1], [0], [0], [1], [0, 0, 1, 1], [], []>} : vector<8x8xf32>, vector<8x32xf32>, vector<8x32xf32> -> vector<8x32xf32>
    %172 = arith.addf %130, %171 : vector<8x32xf32>
    %c0_129 = arith.constant 0 : index
    %c0_130 = arith.constant 0 : index
    %173 = vector.load %arg10[%c0_129, %c0_130] : memref<1x32xf32, #tpu.memory_space<vmem>>, vector<1x32xf32>
    %174 = vector.broadcast %173 : vector<1x32xf32> to vector<8x32xf32>
    %175 = arith.addf %172, %174 : vector<8x32xf32>
    %176 = arith.addf %175, %1 : vector<8x32xf32>
    %cst_131 = arith.constant dense<0.000000e+00> : vector<8xf32>
    %177 = vector.multi_reduction <add>, %176, %cst_131 [1] : vector<8x32xf32> to vector<8xf32>
    %178 = vector.shape_cast %177 : vector<8xf32> to vector<8x1xf32>
    %cst_132 = arith.constant 3.200000e+01 : f32
    %179 = vector.broadcast %cst_132 : f32 to vector<8x1xf32>
    %180 = arith.divf %178, %179 : vector<8x1xf32>
    %181 = vector.broadcast %180 : vector<8x1xf32> to vector<8x32xf32>
    %182 = arith.subf %176, %181 : vector<8x32xf32>
    %183 = arith.mulf %182, %182 : vector<8x32xf32>
    %cst_133 = arith.constant dense<0.000000e+00> : vector<8xf32>
    %184 = vector.multi_reduction <add>, %183, %cst_133 [1] : vector<8x32xf32> to vector<8xf32>
    %185 = vector.shape_cast %184 : vector<8xf32> to vector<8x1xf32>
    %cst_134 = arith.constant 3.200000e+01 : f32
    %186 = vector.broadcast %cst_134 : f32 to vector<8x1xf32>
    %187 = arith.divf %185, %186 : vector<8x1xf32>
    %cst_135 = arith.constant 9.99999996E-13 : f32
    %188 = vector.broadcast %cst_135 : f32 to vector<8x1xf32>
    %189 = arith.addf %187, %188 : vector<8x1xf32>
    %190 = math.rsqrt %189 : vector<8x1xf32>
    %191 = vector.broadcast %190 : vector<8x1xf32> to vector<8x32xf32>
    %192 = arith.mulf %182, %191 : vector<8x32xf32>
    %c0_136 = arith.constant 0 : index
    %c0_137 = arith.constant 0 : index
    %193 = vector.load %arg11[%c0_136, %c0_137] : memref<1x32xf32, #tpu.memory_space<vmem>>, vector<1x32xf32>
    %194 = vector.broadcast %193 : vector<1x32xf32> to vector<8x32xf32>
    %195 = arith.mulf %192, %194 : vector<8x32xf32>
    %c0_138 = arith.constant 0 : index
    %c0_139 = arith.constant 0 : index
    %196 = vector.load %arg12[%c0_138, %c0_139] : memref<1x32xf32, #tpu.memory_space<vmem>>, vector<1x32xf32>
    %197 = vector.broadcast %196 : vector<1x32xf32> to vector<8x32xf32>
    %198 = arith.addf %195, %197 : vector<8x32xf32>
    %c0_140 = arith.constant 0 : index
    %c0_141 = arith.constant 0 : index
    %c0_142 = arith.constant 0 : index
    %199 = vector.load %arg13[%c0_140, %c0_141, %c0_142] : memref<1x8x32xf32, #tpu.memory_space<vmem>>, vector<1x8x32xf32>
    %200 = vector.shape_cast %199 : vector<1x8x32xf32> to vector<8x32xf32>
    %201 = vector.shape_cast %198 : vector<8x32xf32> to vector<1x8x32xf32>
    tpu.vector_store %arg13[%c0_140, %c0_141, %c0_142], %201 {strides = array<i32>} : memref<1x8x32xf32, #tpu.memory_space<vmem>>, vector<1x8x32xf32>,
    return
  }
  func.func @transform_0(%arg0: i32) -> (i32, i32, i32) {
    %c0_i32 = arith.constant 0 : i32
    %c0_i32_0 = arith.constant 0 : i32
    %c0_i32_1 = arith.constant 0 : i32
    return %arg0, %c0_i32, %c0_i32_0 : i32, i32, i32
  }
  func.func @transform_1(%arg0: i32) -> (i32, i32, i32) {
    %c0_i32 = arith.constant 0 : i32
    %c0_i32_0 = arith.constant 0 : i32
    %c0_i32_1 = arith.constant 0 : i32
    return %arg0, %c0_i32, %c0_i32_0 : i32, i32, i32
  }
  func.func @transform_2(%arg0: i32) -> (i32, i32, i32) {
    %c0_i32 = arith.constant 0 : i32
    %c0_i32_0 = arith.constant 0 : i32
    %c0_i32_1 = arith.constant 0 : i32
    %c0_i32_2 = arith.constant 0 : i32
    return %c0_i32, %c0_i32_0, %c0_i32_1 : i32, i32, i32
  }
  func.func @transform_3(%arg0: i32) -> (i32, i32, i32) {
    %c0_i32 = arith.constant 0 : i32
    %c0_i32_0 = arith.constant 0 : i32
    %c0_i32_1 = arith.constant 0 : i32
    %c0_i32_2 = arith.constant 0 : i32
    return %c0_i32, %c0_i32_0, %c0_i32_1 : i32, i32, i32
  }
  func.func @transform_4(%arg0: i32) -> (i32, i32, i32) {
    %c0_i32 = arith.constant 0 : i32
    %c0_i32_0 = arith.constant 0 : i32
    %c0_i32_1 = arith.constant 0 : i32
    %c0_i32_2 = arith.constant 0 : i32
    return %c0_i32, %c0_i32_0, %c0_i32_1 : i32, i32, i32
  }
  func.func @transform_5(%arg0: i32) -> (i32, i32, i32) {
    %c0_i32 = arith.constant 0 : i32
    %c0_i32_0 = arith.constant 0 : i32
    %c0_i32_1 = arith.constant 0 : i32
    %c0_i32_2 = arith.constant 0 : i32
    return %c0_i32, %c0_i32_0, %c0_i32_1 : i32, i32, i32
  }
  func.func @transform_6(%arg0: i32) -> (i32, i32, i32) {
    %c0_i32 = arith.constant 0 : i32
    %c0_i32_0 = arith.constant 0 : i32
    %c0_i32_1 = arith.constant 0 : i32
    %c0_i32_2 = arith.constant 0 : i32
    return %c0_i32, %c0_i32_0, %c0_i32_1 : i32, i32, i32
  }
  func.func @transform_7(%arg0: i32) -> (i32, i32, i32) {
    %c0_i32 = arith.constant 0 : i32
    %c0_i32_0 = arith.constant 0 : i32
    %c0_i32_1 = arith.constant 0 : i32
    %c0_i32_2 = arith.constant 0 : i32
    return %c0_i32, %c0_i32_0, %c0_i32_1 : i32, i32, i32
  }
  func.func @transform_8(%arg0: i32) -> (i32, i32, i32) {
    %c0_i32 = arith.constant 0 : i32
    %c0_i32_0 = arith.constant 0 : i32
    %c0_i32_1 = arith.constant 0 : i32
    %c0_i32_2 = arith.constant 0 : i32
    return %c0_i32, %c0_i32_0, %c0_i32_1 : i32, i32, i32
  }
  func.func @transform_9(%arg0: i32) -> (i32, i32) {
    %c0_i32 = arith.constant 0 : i32
    %c0_i32_0 = arith.constant 0 : i32
    %c0_i32_1 = arith.constant 0 : i32
    return %c0_i32, %c0_i32_0 : i32, i32
  }
  func.func @transform_10(%arg0: i32) -> (i32, i32) {
    %c0_i32 = arith.constant 0 : i32
    %c0_i32_0 = arith.constant 0 : i32
    %c0_i32_1 = arith.constant 0 : i32
    return %c0_i32, %c0_i32_0 : i32, i32
  }
  func.func @transform_11(%arg0: i32) -> (i32, i32) {
    %c0_i32 = arith.constant 0 : i32
    %c0_i32_0 = arith.constant 0 : i32
    %c0_i32_1 = arith.constant 0 : i32
    return %c0_i32, %c0_i32_0 : i32, i32
  }
  func.func @transform_12(%arg0: i32) -> (i32, i32, i32) {
    %c0_i32 = arith.constant 0 : i32
    %c0_i32_0 = arith.constant 0 : i32
    %c0_i32_1 = arith.constant 0 : i32
    return %arg0, %c0_i32, %c0_i32_0 : i32, i32, i32
  }
}

</mosaic_0001>

<bundles_post_ra>
// kernel: tpu_custom_call.1
= control target key start
LH: loop header
LB: loop body
LE: loop exit
PB: predicated region body
PF: predicated region fallthrough
CT: control target
= control target key end

     0   :  { %s3604_s0 = inlined_call_operand.vmem [shape: f32[2,8,32], index: 0, kind: input, shape index: {}]   ;;  %s3605_s1 = inlined_call_operand.vmem [shape: s32[2,8,8], index: 1, kind: input, shape index: {}]   ;;  %s3606_s2 = inlined_call_operand.vmem [shape: f32[4,32,8], index: 2, kind: input, shape index: {}]   ;;  %s3607_s3 = inlined_call_operand.vmem [shape: f32[4,1,8], index: 3, kind: input, shape index: {}]   ;;  %s3608_s4 = inlined_call_operand.vmem [shape: f32[4,32,8], index: 4, kind: input, shape index: {}]   ;;  %s3609_s5 = inlined_call_operand.vmem [shape: f32[4,1,8], index: 5, kind: input, shape index: {}]   ;;  %s3610_s6 = inlined_call_operand.vmem [shape: f32[4,32,8], index: 6, kind: input, shape index: {}]   ;;  %s3611_s7 = inlined_call_operand.vmem [shape: f32[4,1,8], index: 7, kind: input, shape index: {}]   ;;  %s3612_s8 = inlined_call_operand.vmem [shape: f32[4,8,32], index: 8, kind: input, shape index: {}]   ;;  %s3613_s9 = inlined_call_operand.vmem [shape: f32[1,32], index: 9, kind: input, shape index: {}]   ;;  %s3614_s10 = inlined_call_operand.vmem [shape: f32[1,32], index: 10, kind: input, shape index: {}]   ;;  %s3615_s11 = inlined_call_operand.vmem [shape: f32[1,32], index: 11, kind: input, shape index: {}]   ;;  %s3616_s12 = inlined_call_operand.hbm [shape: f32[2,8,32], index: 12, kind: output, shape index: {}]  }
   0x1   :  { %3617 = sst [smem:[#allocation6_spill]] %s3604_s0 }
   0x2   :  { %3618 = sst [smem:[#allocation7_spill]] %s3605_s1 }
   0x3   :  { %17 = vsyncpa [#allocation3], 0 }
   0x4   :  { %19 = vsyncpa [#allocation3 + $0x1], 0  ;;  %s3141_s21 = smov 0   ;;  %s3143_s22 = smov 0  }
   0x5   :  { %s3145_s23 = smov 0   ;;  %s3147_s24 = smov 0  }
   0x6 LB: > { %s3162_s25 = sadd.s32 4294967295, %s3070_s24   ;;  %s2498_s26 = sadd.s32 4294967294, %s3070_s24   ;;  %s3070_s24 = sphi %s3147_s24, %s3628_s24   ;;  %s3066_s23 = sphi %s3145_s23, %s3627_s23   ;;  %s3062_s22 = sphi %s3143_s22, %s3626_s22   ;;  %s3058_s21 = sphi %s3141_s21, %s3625_s21  }
   0x7   : > { %s3166_s27 = sadd.s32 1, %s3070_s24   ;;  %s294_s28 = sadd.s32 1, %s3066_s23 }
   0x8   : > { %s291_s29 = ssub.s32 %s3070_s24, %s3166_s27  ;;  %p304_p0 = scmp.ne.s32.totalorder %s3066_s23, %s3062_s22 }
   0x9   : > { %p292_p1 = scmp.eq.s32.totalorder %s291_s29, 0  ;;  %p305_p2 = scmp.eq.s32.totalorder %s3162_s25, 1 }
   0xa   : > { %p310_p3 = scmp.ne.s32.totalorder %s3062_s22, %s3058_s21  ;;  %p311_p4 = scmp.eq.s32.totalorder %s2498_s26, 1 }
   0xb   : > { %s3177_s30 = scalar_select %p292_p1, %s3066_s23, %s294_s28  }
   0xc   : > { %p3179_p5 = por %p305_p2, %p304_p0  ;;  %p3183_p6 = por %p311_p4, %p310_p3 }
   0xd   : > { %3619 = sst [smem:[#allocation5_spill]] %s3177_s30  ;;  %p2501_p7 = scmp.ge.s32.totalorder %s3070_s24, 1 }
   0xe   : > { %p373_p8 = scmp.lt.s32.totalorder %s3070_s24, 3 }
  0x10   : > { %p374_p9 = pnand %p2501_p7, %p373_p8 }
  0x11   : > { %v432_v0 = vld [vmem:[%s3608_s4] sm:$0xff] (!%p374_p9)  ;;  %v433_v1 = vld [vmem:[%s3608_s4 + $0x8] sm:$0xff] (!%p374_p9)  ;;  %v3072_v3 = vmov (!%p374_p9), 0.0|0.0   ;;  %v434_v6 = vld [vmem:[%s3608_s4 + $0x10] sm:$0xff] (!%p374_p9)  ;;  %p418_p10 = scmp.lt.s32.totalorder (!%p374_p9), %s3162_s25, 1  ;;  %vm3073_vm0 = vmmov (!%p374_p9), 0  }
  0x12   : > { %377 = sbr.rel (%p374_p9) target bundleno = 4216 (0x1078), region = 68  ;;  %v428_v2 = vld [vmem:[%s3606_s2] sm:$0xff] (!%p374_p9)  ;;  %2882 = vmatprep.subr.bf16.mxu1 (!%p374_p9), %v3072_v3  ;;  %v2883_v4 = vpack.c.bf16 (!%p374_p9), %v433_v1, %v432_v0  ;;  %2876 = vmatprep.subr.bf16.mxu0 (!%p374_p9), %v3072_v3  ;;  %v429_v5 = vld [vmem:[%s3606_s2 + $0x8] sm:$0xff] (!%p374_p9)  ;;  %v435_v7 = vld [vmem:[%s3608_s4 + $0x18] sm:$0xff] (!%p374_p9)  ;;  %v3074_v11 = vmov (!%p374_p9), 0.0   ;;  %s3622_s0 = sld [smem:[#allocation6_spill]] (!%p374_p9) }
  0x13   : > { %v2877_v8 = vpack.c.bf16 (!%p374_p9), %v429_v5, %v428_v2  ;;  %v430_v9 = vld [vmem:[%s3606_s2 + $0x10] sm:$0xff] (!%p374_p9)  ;;  %v431_v10 = vld [vmem:[%s3606_s2 + $0x18] sm:$0xff] (!%p374_p9)  ;;  %2703 = vmatprep.mubr.msk.f32.mxu1 (!%p374_p9), %vm3073_vm0, %v3074_v11  ;;  %2692 = vmatprep.mubr.msk.f32.mxu0 (!%p374_p9), %vm3073_vm0, %v3074_v11  ;;  %v2886_v12 = vpack.c.bf16 (!%p374_p9), %v435_v7, %v434_v6  ;;  %vm447_vm1 = vcmask (!%p374_p9), 261120   ;;  %v2507_v15 = vld [vmem:[%s3609_s5] ss:$0 sm:$0xff] (!%p374_p9)  ;;  %vm675_vm2 = vcmask (!%p374_p9), 64512  }
  0x14   : > { %2884 = vmatpush3.bf16.msra.mxu1 (!%p374_p9), %v2883_v4  ;;  %v2880_v13 = vpack.c.bf16 (!%p374_p9), %v431_v10, %v430_v9  ;;  %v2505_v16 = vld [vmem:[%s3607_s3] ss:$0 sm:$0xff] (!%p374_p9)  ;;  %v437_v24 = vld [vmem:[%s3610_s6 + $0x8] sm:$0xff] (!%p374_p9)  ;;  %v438_v25 = vld [vmem:[%s3610_s6 + $0x10] sm:$0xff] (!%p374_p9)  ;;  %s3623_s1 = sld [smem:[#allocation7_spill]] (!%p374_p9)  ;;  %s2597_s28 = sshll.u32 (!%p374_p9), %s3162_s25, 7 }
  0x15   : > { %2878 = vmatpush3.bf16.msra.mxu0 (!%p374_p9), %v2877_v8  ;;  %2885 = vmatprep.subr.bf16.mxu1 (!%p374_p9), %v3072_v3  ;;  %v436_v23 = vld [vmem:[%s3610_s6] sm:$0xff] (!%p374_p9)  ;;  %v439_v27 = vld [vmem:[%s3610_s6 + $0x18] sm:$0xff] (!%p374_p9)  ;;  %v2515_v45 = vld [vmem:[%s3606_s2 + $0x28] sm:$0xff] (!%p374_p9) }
  0x16   : > { %2879 = vmatprep.subr.bf16.mxu0 (!%p374_p9), %v3072_v3  ;;  %v2889_v26 = vpack.c.bf16 (!%p374_p9), %v437_v24, %v436_v23  ;;  %v2892_v28 = vpack.c.bf16 (!%p374_p9), %v439_v27, %v438_v25  ;;  %v2509_v41 = vld [vmem:[%s3611_s7] ss:$0 sm:$0xff] (!%p374_p9)  ;;  %v2516_v47 = vld [vmem:[%s3606_s2 + $0x30] sm:$0xff] (!%p374_p9)  ;;  %v2517_v48 = vld [vmem:[%s3606_s2 + $0x38] sm:$0xff] (!%p374_p9) }
  0x17   : > { %v2514_v44 = vld [vmem:[%s3606_s2 + $0x20] sm:$0xff] (!%p374_p9)  ;;  %v2898_v49 = vpack.c.bf16 (!%p374_p9), %v2517_v48, %v2516_v47  ;;  %v2519_v52 = vld [vmem:[%s3608_s4 + $0x28] sm:$0xff] (!%p374_p9)  ;;  %v2520_v56 = vld [vmem:[%s3608_s4 + $0x30] sm:$0xff] (!%p374_p9) }
  0x18   : > { %2887 = vmatpush3.bf16.msra.mxu1 (!%p374_p9), %v2886_v12  ;;  %v2895_v46 = vpack.c.bf16 (!%p374_p9), %v2515_v45, %v2514_v44  ;;  %v2518_v51 = vld [vmem:[%s3608_s4 + $0x20] sm:$0xff] (!%p374_p9)  ;;  %v2521_v57 = vld [vmem:[%s3608_s4 + $0x38] sm:$0xff] (!%p374_p9)  ;;  %v2523_v7 = vld [vmem:[%s3610_s6 + $0x28] sm:$0xff] (!%p374_p9) }
  0x19   : > { %s3221_s26 = scalar_select %p418_p10, %s3162_s25, 1  ;;  %2881 = vmatpush3.bf16.msra.mxu0 %v2880_v13  ;;  %2717 = vmatprep.subr.mxu1 %v3074_v11  ;;  %v2901_v54 = vpack.c.bf16 %v2519_v52, %v2518_v51  ;;  %v2904_v58 = vpack.c.bf16 %v2521_v57, %v2520_v56  ;;  %v2530_v63 = vld [vmem:[%s3609_s5 + $0x1] ss:$0 sm:$0xff]  ;;  %v2524_v8 = vld [vmem:[%s3610_s6 + $0x30] sm:$0xff]  ;;  %v2525_v10 = vld [vmem:[%s3610_s6 + $0x38] sm:$0xff] }
  0x1a   : > { %2888 = vmatprep.subr.bf16.mxu0 %v3072_v3  ;;  %v2527_v0 = vld [vmem:[%s3607_s3 + $0x1] ss:$0 sm:$0xff]  ;;  %v2910_v12 = vpack.c.bf16 %v2525_v10, %v2524_v8  ;;  %v2544_v44 = vld [vmem:[%s3606_s2 + $0x58] sm:$0xff]  ;;  %v2554_v57 = vld [vmem:[%s3607_s3 + $0x2] ss:$0 sm:$0xff]  ;;  %s3075_s25 = smov [#allocation2]  }
  0x1b   : > { %s2503_s30 = sshll.u32 %s3221_s26, 3  ;;  %v2522_v6 = vld [vmem:[%s3610_s6 + $0x20] sm:$0xff] }
  0x1c   : > { %s421_s15 = scalar_lea.vmem %s3622_s0, %s2503_s30  ;;  %s425_s29 = scalar_lea.vmem %s3623_s1, %s2503_s30  ;;  %v2907_v9 = vpack.c.bf16 %v2523_v7, %v2522_v6  ;;  %v2533_v25 = vld [vmem:[%s3611_s7 + $0x1] ss:$0 sm:$0xff] }
  0x1d   : > { %v3231_v14 = vld [vmem:[%s421_s15] sm:$0xff]  ;;  %s415_s15 = sand.u32 1, %s3062_s22   ;;  %s3561_s1 = scalar_lea.hbm %s3616_s12, %s2597_s28 }
  0x1e   : > { %2704 = vmatmul.mubr.msk.f32.vlgmr.msra.gmra.mrb[0].mxu1 %vm447_vm1, %v3231_v14  ;;  %2693 = vmatmul.mubr.msk.f32.vlgmr.msra.gmra.mrb[0].mxu0 %vm447_vm1, %v3231_v14  ;;  %v3277_v29 = vld [vmem:[%s425_s29] sm:$0xff]  ;;  %s2502_s16 = sshll.u32 %s415_s15, 3  ;;  %s2414_s17 = scalar_lea.sflag [#allocation3], %s415_s15 }
  0x1f   : > { %2719 = vmatprep.mubr.msk.f32.mxu1 %vm3073_vm0, %v3074_v11  ;;  %2714 = vmatprep.mubr.msk.f32.mxu0 %vm3073_vm0, %v3074_v11  ;;  %vm753_vm3 = vcmp.eq.s32.totalorder %v3277_v29, 0  ;;  %v2591_v29 = vld [vmem:[%s3612_s8 + $0x18] sm:$0xff]  ;;  %s417_s29 = scalar_lea.vmem [#allocation2], %s2502_s16  ;;  %s3012_s16 = sshll.u32 %s3075_s25, 4  ;;  %s3013_s16 = int_to_ptr.vmem [resolvable:$false] %s3012_s16 }
  0x20   : > { %2890 = vmatpush3.bf16.msra.mxu0 %v2889_v26  ;;  %s2427_s26 = sshll.u32 %s417_s29, 4  ;;  %s3014_s19 = scalar_lea.vmem %s3013_s16, 256  ;;  %s3563_s26 = int_to_ptr.vmem [resolvable:$true] %s2427_s26 }
  0x21   : > { %2891 = vmatprep.subr.bf16.mxu0 %v3072_v3  ;;  %s3008_s18 = scalar_lea.vmem %s3563_s26, 128  ;;  %p3015_p0 = scmp.lt.s32.totalorder %s3563_s26, %s3013_s16 }
  0x22   : > { %p3009_p11 = scmp.ne.s32.totalorder %s3563_s26, %s3008_s18  ;;  %p3016_p1 = scmp.lt.s32.totalorder %s3014_s19, %s3008_s18 }
  0x24   : > { %2893 = vmatpush3.bf16.msra.mxu0 %v2892_v28  ;;  %v2538_v28 = vld [vmem:[%s3612_s8 + $0x8] sm:$0xff]  ;;  %p3010_p12 = pnand %p3009_p11, %p3179_p5  ;;  %p3017_p2 = por %p3016_p1, %p3015_p0 }
  0x25   : > { %2894 = vmatprep.subr.bf16.mxu0 %v3072_v3 }
  0x26   : > { %p3011_p13 = pneg %p3010_p12 }
  0x27   : > { %2715 = vmatmul.mubr.msk.f32.vlgmr.msra.gmra.mrb[2].mxu0 %vm447_vm1, %v3231_v14 }
  0x28   : > { %2735 = vmatprep.mubr.msk.f32.mxu0 %vm3073_vm0, %v3074_v11  ;;  %2896 = vmatpush3.bf16.msra.mxu0 %v2895_v46  ;;  %p3018_p3 = pnand %p3017_p2, %p3011_p13 }
  0x29   : > { %2897 = vmatprep.subr.bf16.mxu0 %v3072_v3 }
  0x2c   : > { %2899 = vmatpush3.bf16.msra.mxu0 %v2898_v49 }
  0x2d   : > { %2906 = vmatprep.subr.bf16.mxu0 %v3072_v3 }
  0x2f   : > { %2736 = vmatmul.mubr.msk.f32.vlgmr.msra.gmra.mrb[4].mxu0 %vm447_vm1, %v3231_v14 }
  0x30   : > { %2757 = vmatprep.mubr.msk.f32.mxu0 %vm3073_vm0, %v3074_v11  ;;  %2908 = vmatpush3.bf16.msra.mxu0 %v2907_v9 }
  0x31   : > { %2909 = vmatprep.subr.bf16.mxu0 %v3072_v3 }
  0x34   : > { %2911 = vmatpush3.bf16.msra.mxu0 %v2910_v12 }
  0x35   : > { %2770 = vmatprep.subr.mxu0 %v3074_v11 }
  0x37   : > { %2758 = vmatmul.mubr.msk.f32.vlgmr.msra.gmra.mrb[6].mxu0 %vm447_vm1, %v3231_v14 }
  0x38   : > { %2772 = vmatprep.mubr.msk.f32.mxu0 %vm3073_vm0, %v3074_v11  ;;  %2771 = vmatpush3.msra.mxu0 %v2538_v28  ;;  %v2570_v28 = vld [vmem:[%s3606_s2 + $0x78] sm:$0xff] }
  0x39   : > { %2912 = vmatprep.subr.bf16.mxu0 %v3072_v3 }
  0xf1   : > { %v594_v17 = vpop.f32.mrb[0].mxu1  ;;  %v517_v20 = vpop.f32.mrb[0].mxu0 }
  0xf2   : > { %v595_v18 = vadd.f32 %v2507_v15, %v594_v17  ;;  %v2705_v19 = vpop.f32.mrb[1].mxu1  ;;  %v518_v21 = vadd.f32 %v2505_v16, %v517_v20  ;;  %v2694_v22 = vpop.f32.mrb[1].mxu0 }
  0xf4   : > { %2718 = vmatpush3.xpose.msk.msra.mxu1 %vm675_vm2, %v595_v18 }
  0xf5   : > { %2722 = vmatprep.subr.mxu1 %v3074_v11 }
  0xf7   : > { %2720 = vmatmul.mubr.msk.f32.vlgmr.msra.gmra.mrb[2].mxu1 %vm675_vm2, %v518_v21 }
  0xf8   : > { %2724 = vmatprep.mubr.msk.f32.mxu1 %vm3073_vm0, %v3074_v11 }
  0xfa   : > { %v671_v40 = vpop.f32.mrb[2].mxu0 }
  0xfb   : > { %v2716_v42 = vpop.f32.mrb[3].mxu0  ;;  %v672_v43 = vadd.f32 %v2509_v41, %v671_v40  ;;  %v2541_v40 = vld [vmem:[%s3606_s2 + $0x40] sm:$0xff]  ;;  %v2542_v41 = vld [vmem:[%s3606_s2 + $0x48] sm:$0xff] }
  0xfc   : > { %v2913_v42 = vpack.c.bf16 %v2542_v41, %v2541_v40 }
  0xfd   : > { %2723 = vmatpush3.msra.mxu1 %v672_v43  ;;  %v2543_v43 = vld [vmem:[%s3606_s2 + $0x50] sm:$0xff] }
  0xfe   : > { %2900 = vmatprep.subr.bf16.mxu1 %v3072_v3  ;;  %v2916_v47 = vpack.c.bf16 %v2544_v44, %v2543_v43  ;;  %v2583_v44 = vld [vmem:[%s3609_s5 + $0x3] ss:$0 sm:$0xff] }
 0x102   : > { %v929_v59 = vpop.f32.mrb[4].mxu0 }
 0x103   : > { %v2737_v60 = vpop.f32.mrb[5].mxu0  ;;  %v930_v5 = vadd.f32 %v2527_v0, %v929_v59 }
 0x10a   : > { %v1085_v24 = vpop.f32.mrb[6].mxu0 }
 0x10b   : > { %v2759_v26 = vpop.f32.mrb[7].mxu0  ;;  %v1086_v27 = vadd.f32 %v2533_v25, %v1085_v24  ;;  %v2567_v24 = vld [vmem:[%s3606_s2 + $0x60] sm:$0xff]  ;;  %v2568_v25 = vld [vmem:[%s3606_s2 + $0x68] sm:$0xff] }
 0x10c   : > { %v2931_v26 = vpack.c.bf16 %v2568_v25, %v2567_v24 }
 0x1ca   : > { %v748_v30 = vpop.f32.mrb[2].mxu1 }
 0x1cb   : > { %v752_v31 = vmul.f32 0.35355338, %v748_v30  ;;  %v2721_v32 = vpop.f32.mrb[3].mxu1 }
 0x1cd   : > { %v754_v33 = vsel %vm753_vm3, -1e+09, %v752_v31 }
 0x1ce   : > { %v755_v34 = vsel %vm675_vm2, %v754_v33, -inf }
 0x1cf   : > { %756 = vmax.xlane.f32.xlu0 %v755_v34  ;;  %v2545_v34 = vld [vmem:[%s3608_s4 + $0x40] sm:$0xff] }
 0x25c   : > { %v757_v35 = vpop.xlane.xlu0 %756 }
 0x25d   : > { %v758_v36 = vsub.f32 %v754_v33, %v757_v35  ;;  %v839_v33 = vld [vmem:[%s3612_s8] sm:$0xff]  ;;  %v2546_v35 = vld [vmem:[%s3608_s4 + $0x48] sm:$0xff] }
 0x25f   : > { %v759_v37 = vmul.f32 1.442695, %v758_v36  ;;  %v2919_v36 = vpack.c.bf16 %v2546_v35, %v2545_v34  ;;  %v2573_v34 = vld [vmem:[%s3608_s4 + $0x70] sm:$0xff]  ;;  %v2574_v35 = vld [vmem:[%s3608_s4 + $0x78] sm:$0xff] }
 0x261   : > { %2990 = vpow2.f32 %v759_v37  ;;  %v2547_v37 = vld [vmem:[%s3608_s4 + $0x50] sm:$0xff] }
 0x26b   : > { %v2991_v38 = vpop.eup %2990 }
 0x26c   : > { %v761_v39 = vsel %vm675_vm2, %v2991_v38, 0.0 }
 0x26d   : > { %762 = vadd.xlane.f32.xlu0 %v761_v39 }
 0x2fa   : > { %v763_v50 = vpop.xlane.xlu0 %762 }
 0x2fb   : > { %2992 = vrcp.f32 %v763_v50  ;;  %v2557_v50 = vld [vmem:[%s3609_s5 + $0x2] ss:$0 sm:$0xff] }
 0x305   : > { %v2993_v53 = vpop.eup %2992 }
 0x306   : > { %v765_v55 = vmul.f32 %v2993_v53, %v2991_v38  ;;  %v2548_v38 = vld [vmem:[%s3608_s4 + $0x58] sm:$0xff] }
 0x307   : > { %v2922_v39 = vpack.c.bf16 %v2548_v38, %v2547_v37  ;;  %v2940_v38 = vpack.c.bf16 %v2574_v35, %v2573_v34 }
 0x308   : > { %2725 = vmatmul.mubr.msk.f32.vlgmr.msra.gmra.mrb[4].mxu1 %vm675_vm2, %v765_v55 }
 0x309   : > { %2902 = vmatpush3.bf16.msra.mxu1 %v2901_v54  ;;  %2746 = vmatprep.mubr.msk.f32.mxu1 %vm3073_vm0, %v3074_v11 }
 0x30a   : > { %2903 = vmatprep.subr.bf16.mxu1 %v3072_v3 }
 0x30d   : > { %2905 = vmatpush3.bf16.msra.mxu1 %v2904_v58 }
 0x30e   : > { %2760 = vmatprep.subr.mxu1 %v3074_v11 }
 0x310   : > { %2747 = vmatmul.mubr.msk.f32.vlgmr.msra.gmra.mrb[6].mxu1 %vm447_vm1, %v3231_v14 }
 0x311   : > { %2762 = vmatprep.mubr.msk.f32.mxu1 %vm3073_vm0, %v3074_v11 }
 0x3db   : > { %v835_v61 = vpop.f32.mrb[4].mxu1 }
 0x3dc   : > { %v2726_v62 = vpop.f32.mrb[5].mxu1 }
 0x3dd   : > { %v2550_v62 = vld [vmem:[%s3610_s6 + $0x48] sm:$0xff] }
 0x3e3   : > { %v1007_v1 = vpop.f32.mrb[6].mxu1 }
 0x3e4   : > { %v1008_v2 = vadd.f32 %v2530_v63, %v1007_v1  ;;  %v2748_v4 = vpop.f32.mrb[7].mxu1  ;;  %v2551_v63 = vld [vmem:[%s3610_s6 + $0x50] sm:$0xff]  ;;  %v2552_v1 = vld [vmem:[%s3610_s6 + $0x58] sm:$0xff] }
 0x3e6   : > { %2761 = vmatpush3.xpose.msk.msra.mxu1 %vm675_vm2, %v1008_v2  ;;  %v2928_v2 = vpack.c.bf16 %v2552_v1, %v2551_v63 }
 0x3e7   : > { %2765 = vmatprep.subr.mxu1 %v3074_v11 }
 0x3e9   : > { %2763 = vmatmul.mubr.msk.f32.vlgmr.msra.gmra.mrb[8].mxu1 %vm675_vm2, %v930_v5 }
 0x3ea   : > { %2767 = vmatprep.mubr.msk.f32.mxu1 %vm3073_vm0, %v3074_v11  ;;  %2766 = vmatpush3.msra.mxu1 %v1086_v27  ;;  %v2569_v27 = vld [vmem:[%s3606_s2 + $0x70] sm:$0xff] }
 0x3eb   : > { %2775 = vmatprep.subr.mxu1 %v3074_v11 }
 0x4bc   : > { %v1161_v13 = vpop.f32.mrb[8].mxu1 }
 0x4bd   : > { %v1165_v15 = vmul.f32 0.35355338, %v1161_v13  ;;  %v2764_v16 = vpop.f32.mrb[9].mxu1 }
 0x4bf   : > { %v1166_v17 = vsel %vm753_vm3, -1e+09, %v1165_v15 }
 0x4c0   : > { %v1167_v18 = vsel %vm675_vm2, %v1166_v17, -inf }
 0x4c1   : > { %1168 = vmax.xlane.f32.xlu1 %v1167_v18 }
 0x54e   : > { %v1169_v19 = vpop.xlane.xlu1 %1168 }
 0x54f   : > { %v1170_v20 = vsub.f32 %v1166_v17, %v1169_v19  ;;  %v2560_v17 = vld [vmem:[%s3611_s7 + $0x2] ss:$0 sm:$0xff] }
 0x551   : > { %v1171_v21 = vmul.f32 1.442695, %v1170_v20  ;;  %v2565_v20 = vld [vmem:[%s3612_s8 + $0x10] sm:$0xff] }
 0x553   : > { %2994 = vpow2.f32 %v1171_v21 }
 0x55d   : > { %v2995_v22 = vpop.eup %2994 }
 0x55e   : > { %v1173_v23 = vsel %vm675_vm2, %v2995_v22, 0.0 }
 0x55f   : > { %1174 = vadd.xlane.f32.xlu1 %v1173_v23 }
 0x5ec   : > { %v1175_v30 = vpop.xlane.xlu1 %1174 }
 0x5ed   : > { %2996 = vrcp.f32 %v1175_v30  ;;  %v2934_v30 = vpack.c.bf16 %v2570_v28, %v2569_v27 }
 0x5f7   : > { %v2997_v31 = vpop.eup %2996 }
 0x5f8   : > { %v1177_v32 = vmul.f32 %v2997_v31, %v2995_v22  ;;  %v2571_v31 = vld [vmem:[%s3608_s4 + $0x60] sm:$0xff] }
 0x5fa   : > { %2768 = vmatmul.mubr.msk.f32.vlgmr.msra.gmra.mrb[10].mxu1 %vm675_vm2, %v1177_v32  ;;  %v2572_v32 = vld [vmem:[%s3608_s4 + $0x68] sm:$0xff] }
 0x5fb   : > { %2776 = vmatpush3.msra.mxu1 %v839_v33  ;;  %2777 = vmatprep.mubr.msk.f32.mxu1 %vm3073_vm0, %v3074_v11  ;;  %v2937_v33 = vpack.c.bf16 %v2572_v32, %v2571_v31 }
 0x5fc   : > { %2918 = vmatprep.subr.bf16.mxu1 %v3072_v3 }
 0x5fe   : > { %2778 = vmatmul.mubr.msk.f32.vlgmr.msra.gmra.mrb[12].mxu1 %vm675_vm2, %v835_v61  ;;  %v2549_v61 = vld [vmem:[%s3610_s6 + $0x40] sm:$0xff] }
 0x5ff   : > { %2920 = vmatpush3.bf16.msra.mxu1 %v2919_v36  ;;  %2799 = vmatprep.mubr.msk.f32.mxu1 %vm3073_vm0, %v3074_v11  ;;  %v2925_v0 = vpack.c.bf16 %v2550_v62, %v2549_v61 }
 0x600   : > { %2921 = vmatprep.subr.bf16.mxu1 %v3072_v3 }
 0x603   : > { %2923 = vmatpush3.bf16.msra.mxu1 %v2922_v39 }
 0x604   : > { %2813 = vmatprep.subr.mxu1 %v3074_v11 }
 0x606   : > { %2800 = vmatmul.mubr.msk.f32.vlgmr.msra.gmra.mrb[14].mxu1 %vm447_vm1, %v3231_v14 }
 0x607   : > { %2815 = vmatprep.mubr.msk.f32.mxu1 %vm3073_vm0, %v3074_v11 }
 0x6cd   : > { %v1247_v45 = vpop.f32.mrb[10].mxu1 }
 0x6ce   : > { %v2769_v46 = vpop.f32.mrb[11].mxu1  ;;  %2773 = vmatmul.mubr.msk.f32.vlgmr.msra.gmra.mrb[8].mxu0 %vm675_vm2, %v1247_v45  ;;  %v2580_v45 = vld [vmem:[%s3607_s3 + $0x3] ss:$0 sm:$0xff] }
 0x6cf   : > { %2914 = vmatpush3.bf16.msra.mxu0 %v2913_v42  ;;  %2788 = vmatprep.mubr.msk.f32.mxu0 %vm3073_vm0, %v3074_v11 }
 0x6d0   : > { %2915 = vmatprep.subr.bf16.mxu0 %v3072_v3 }
 0x6d1   : > { %v1395_v48 = vpop.f32.mrb[12].mxu1 }
 0x6d2   : > { %v2779_v49 = vpop.f32.mrb[13].mxu1 }
 0x6d3   : > { %2917 = vmatpush3.bf16.msra.mxu0 %v2916_v47 }
 0x6d4   : > { %2924 = vmatprep.subr.bf16.mxu0 %v3072_v3 }
 0x6d6   : > { %2789 = vmatmul.mubr.msk.f32.vlgmr.msra.gmra.mrb[10].mxu0 %vm447_vm1, %v3231_v14 }
 0x6d7   : > { %2810 = vmatprep.mubr.msk.f32.mxu0 %vm3073_vm0, %v3074_v11  ;;  %2926 = vmatpush3.bf16.msra.mxu0 %v2925_v0 }
 0x6d8   : > { %2927 = vmatprep.subr.bf16.mxu0 %v3072_v3 }
 0x6d9   : > { %v1566_v51 = vpop.f32.mrb[14].mxu1 }
 0x6da   : > { %v1567_v52 = vadd.f32 %v2557_v50, %v1566_v51  ;;  %v2801_v53 = vpop.f32.mrb[15].mxu1  ;;  %v2575_v50 = vld [vmem:[%s3610_s6 + $0x60] sm:$0xff]  ;;  %v2576_v51 = vld [vmem:[%s3610_s6 + $0x68] sm:$0xff] }
 0x6db   : > { %2929 = vmatpush3.bf16.msra.mxu0 %v2928_v2  ;;  %v2943_v53 = vpack.c.bf16 %v2576_v51, %v2575_v50 }
 0x6dc   : > { %2814 = vmatpush3.xpose.msk.msra.mxu1 %vm675_vm2, %v1567_v52  ;;  %2823 = vmatprep.subr.mxu0 %v3074_v11  ;;  %v2577_v52 = vld [vmem:[%s3610_s6 + $0x70] sm:$0xff] }
 0x6dd   : > { %2818 = vmatprep.subr.mxu1 %v3074_v11 }
 0x6de   : > { %2811 = vmatmul.mubr.msk.f32.vlgmr.msra.gmra.mrb[12].mxu0 %vm447_vm1, %v3231_v14 }
 0x6df   : > { %2825 = vmatprep.mubr.msk.f32.mxu0 %vm3073_vm0, %v3074_v11  ;;  %2824 = vmatpush3.msra.mxu0 %v2565_v20 }
 0x6e0   : > { %2936 = vmatprep.subr.bf16.mxu0 %v3072_v3 }
 0x7a1   : > { %v1322_v54 = vpop.f32.mrb[8].mxu0 }
 0x7a2   : > { %v3422_v55 = vadd.f32 %v1395_v48, %v1322_v54  ;;  %v2774_v56 = vpop.f32.mrb[9].mxu0  ;;  %v2578_v54 = vld [vmem:[%s3610_s6 + $0x78] sm:$0xff] }
 0x7a9   : > { %v1488_v58 = vpop.f32.mrb[10].mxu0 }
 0x7aa   : > { %v1489_v59 = vadd.f32 %v2554_v57, %v1488_v58  ;;  %v2790_v60 = vpop.f32.mrb[11].mxu0 }
 0x7ac   : > { %2816 = vmatmul.mubr.msk.f32.vlgmr.msra.gmra.mrb[16].mxu1 %vm675_vm2, %v1489_v59 }
 0x7ad   : > { %2820 = vmatprep.mubr.msk.f32.mxu1 %vm3073_vm0, %v3074_v11 }
 0x7b1   : > { %v1644_v16 = vpop.f32.mrb[12].mxu0 }
 0x7b2   : > { %v2812_v18 = vpop.f32.mrb[13].mxu0  ;;  %v1645_v19 = vadd.f32 %v2560_v17, %v1644_v16 }
 0x7b4   : > { %2819 = vmatpush3.msra.mxu1 %v1645_v19 }
 0x7b5   : > { %2930 = vmatprep.subr.bf16.mxu1 %v3072_v3 }
 0x87f   : > { %v1720_v4 = vpop.f32.mrb[16].mxu1 }
 0x880   : > { %v1724_v5 = vmul.f32 0.35355338, %v1720_v4  ;;  %v2817_v6 = vpop.f32.mrb[17].mxu1 }
 0x882   : > { %v1725_v7 = vsel %vm753_vm3, -1e+09, %v1724_v5 }
 0x883   : > { %v1726_v8 = vsel %vm675_vm2, %v1725_v7, -inf }
 0x884   : > { %1727 = vmax.xlane.f32.xlu0 %v1726_v8 }
 0x911   : > { %v1728_v9 = vpop.xlane.xlu0 %1727 }
 0x912   : > { %v1729_v10 = vsub.f32 %v1725_v7, %v1728_v9 }
 0x914   : > { %v1730_v12 = vmul.f32 1.442695, %v1729_v10 }
 0x916   : > { %2998 = vpow2.f32 %v1730_v12  ;;  %v2593_v12 = vld [vmem:[%s3613_s9] ss:$0 sm:$0xff] }
 0x920   : > { %v2999_v13 = vpop.eup %2998 }
 0x921   : > { %v1732_v15 = vsel %vm675_vm2, %v2999_v13, 0.0 }
 0x922   : > { %1733 = vadd.xlane.f32.xlu1 %v1732_v15 }
 0x9af   : > { %v1734_v21 = vpop.xlane.xlu1 %1733 }
 0x9b0   : > { %3000 = vrcp.f32 %v1734_v21 }
 0x9ba   : > { %v3001_v22 = vpop.eup %3000 }
 0x9bb   : > { %v1736_v23 = vmul.f32 %v3001_v22, %v2999_v13 }
 0x9bd   : > { %2821 = vmatmul.mubr.msk.f32.vlgmr.msra.gmra.mrb[18].mxu1 %vm675_vm2, %v1736_v23 }
 0x9be   : > { %2836 = vmatprep.mubr.msk.f32.mxu1 %vm3073_vm0, %v3074_v11  ;;  %2932 = vmatpush3.bf16.msra.mxu1 %v2931_v26 }
 0x9bf   : > { %2933 = vmatprep.subr.bf16.mxu1 %v3072_v3 }
 0x9c2   : > { %2935 = vmatpush3.bf16.msra.mxu1 %v2934_v30  ;;  %v2595_v30 = vld [vmem:[%s3615_s11] ss:$0 sm:$0xff] }
 0x9c3   : > { %2942 = vmatprep.subr.bf16.mxu1 %v3072_v3 }
 0x9c5   : > { %2837 = vmatmul.mubr.msk.f32.vlgmr.msra.gmra.mrb[20].mxu1 %vm447_vm1, %v3231_v14 }
 0x9c6   : > { %2858 = vmatprep.mubr.msk.f32.mxu1 %vm3073_vm0, %v3074_v11  ;;  %2944 = vmatpush3.bf16.msra.mxu1 %v2943_v53 }
 0x9c7   : > { %2945 = vmatprep.subr.bf16.mxu1 %v3072_v3 }
 0xa90   : > { %v1806_v36 = vpop.f32.mrb[18].mxu1 }
 0xa91   : > { %v2822_v37 = vpop.f32.mrb[19].mxu1  ;;  %2826 = vmatmul.mubr.msk.f32.vlgmr.msra.gmra.mrb[14].mxu0 %vm675_vm2, %v1806_v36 }
 0xa92   : > { %2938 = vmatpush3.bf16.msra.mxu0 %v2937_v33  ;;  %2847 = vmatprep.mubr.msk.f32.mxu0 %vm3073_vm0, %v3074_v11 }
 0xa93   : > { %2939 = vmatprep.subr.bf16.mxu0 %v3072_v3 }
 0xa96   : > { %2941 = vmatpush3.bf16.msra.mxu0 %v2940_v38 }
 0xa97   : > { %2861 = vmatprep.subr.mxu0 %v3074_v11 }
 0xa98   : > { %v1975_v39 = vpop.f32.mrb[20].mxu1 }
 0xa99   : > { %2848 = vmatmul.mubr.msk.f32.vlgmr.msra.gmra.mrb[16].mxu0 %vm447_vm1, %v3231_v14  ;;  %v2838_v40 = vpop.f32.mrb[21].mxu1  ;;  %v1976_v49 = vadd.f32 %v2580_v45, %v1975_v39 }
 0xa9a   : > { %2863 = vmatprep.mubr.msk.f32.mxu0 %vm3073_vm0, %v3074_v11 }
 0xb64   : > { %v1881_v41 = vpop.f32.mrb[14].mxu0 }
 0xb65   : > { %v1885_v42 = vadd.f32 %v1881_v41, %v3422_v55  ;;  %v2827_v43 = vpop.f32.mrb[15].mxu0  ;;  %v2946_v55 = vpack.c.bf16 %v2578_v54, %v2577_v52 }
 0xb67   : > { %2947 = vmatpush3.bf16.msra.mxu1 %v2946_v55 }
 0xb68   : > { %2871 = vmatprep.subr.mxu1 %v3074_v11 }
 0xb6a   : > { %2859 = vmatmul.mubr.msk.f32.vlgmr.msra.gmra.mrb[22].mxu1 %vm447_vm1, %v3231_v14 }
 0xb6b   : > { %2873 = vmatprep.mubr.msk.f32.mxu1 %vm3073_vm0, %v3074_v11  ;;  %2872 = vmatpush3.msra.mxu1 %v2591_v29 }
 0xb6c   : > { %v2053_v46 = vpop.f32.mrb[16].mxu0 }
 0xb6d   : > { %v2054_v47 = vadd.f32 %v2583_v44, %v2053_v46  ;;  %v2849_v48 = vpop.f32.mrb[17].mxu0 }
 0xb6f   : > { %2862 = vmatpush3.xpose.msk.msra.mxu0 %vm675_vm2, %v2054_v47 }
 0xb70   : > { %2866 = vmatprep.subr.mxu0 %v3074_v11 }
 0xb72   : > { %2864 = vmatmul.mubr.msk.f32.vlgmr.msra.gmra.mrb[18].mxu0 %vm675_vm2, %v1976_v49 }
 0xb73   : > { %2868 = vmatprep.mubr.msk.f32.mxu0 %vm3073_vm0, %v3074_v11  ;;  %v2586_v11 = vld [vmem:[%s3611_s7 + $0x3] ss:$0 sm:$0xff] }
 0xc3d   : > { %v2131_v1 = vpop.f32.mrb[22].mxu1 }
 0xc3e   : > { %v2860_v2 = vpop.f32.mrb[23].mxu1  ;;  %v2132_v4 = vadd.f32 %v2586_v11, %v2131_v1 }
 0xc40   : > { %2867 = vmatpush3.msra.mxu0 %v2132_v4 }
 0xc45   : > { %v2207_v56 = vpop.f32.mrb[18].mxu0 }
 0xc46   : > { %v2211_v57 = vmul.f32 0.35355338, %v2207_v56  ;;  %v2865_v58 = vpop.f32.mrb[19].mxu0 }
 0xc48   : > { %v2212_v59 = vsel %vm753_vm3, -1e+09, %v2211_v57 }
 0xc49   : > { %v2213_v60 = vsel %vm675_vm2, %v2212_v59, -inf }
 0xc4a   : > { %2214 = vmax.xlane.f32.xlu0 %v2213_v60 }
 0xcd7   : > { %v2215_v61 = vpop.xlane.xlu0 %2214 }
 0xcd8   : > { %v2216_v3 = vsub.f32 %v2212_v59, %v2215_v61 }
 0xcda   : > { %v2217_v62 = vmul.f32 1.442695, %v2216_v3 }
 0xcdc   : > { %3002 = vpow2.f32 %v2217_v62 }
 0xce6   : > { %v3003_v63 = vpop.eup %3002 }
 0xce7   : > { %v2219_v0 = vsel %vm675_vm2, %v3003_v63, 0.0 }
 0xce8   : > { %2220 = vadd.xlane.f32.xlu1 %v2219_v0 }
 0xd75   : > { %v2221_v5 = vpop.xlane.xlu1 %2220 }
 0xd76   : > { %3004 = vrcp.f32 %v2221_v5 }
 0xd80   : > { %v3005_v6 = vpop.eup %3004 }
 0xd81   : > { %v2223_v7 = vmul.f32 %v3005_v6, %v3003_v63 }
 0xd83   : > { %2869 = vmatmul.mubr.msk.f32.vlgmr.msra.gmra.mrb[20].mxu0 %vm675_vm2, %v2223_v7 }
 0xe56   : > { %v2293_v8 = vpop.f32.mrb[20].mxu0 }
 0xe57   : > { %v2870_v9 = vpop.f32.mrb[21].mxu0  ;;  %2874 = vmatmul.mubr.msk.f32.vlgmr.msra.gmra.mrb[24].mxu1 %vm675_vm2, %v2293_v8 }
 0xf2a   : > { %v2368_v10 = vpop.f32.mrb[24].mxu1 }
 0xf2b   : > { %v2372_v13 = vadd.f32 %v2368_v10, %v1885_v42  ;;  %v2875_v15 = vpop.f32.mrb[25].mxu1 }
 0xf2d   : > { %v2380_v16 = vadd.f32 %v2593_v12, %v2372_v13 }
 0xf2f   : > { %v2381_v17 = vadd.f32 %v2380_v16, %v3231_v14  ;;  %v2594_v14 = vld [vmem:[%s3614_s10] ss:$0 sm:$0xff] }
 0xf31   : > { %v2382_v18 = vsel %vm447_vm1, %v2381_v17, 0.0 }
 0xf32   : > { %2383 = vadd.xlane.f32.xlu0 %v2382_v18 }
 0xfbf   : > { %v2384_v19 = vpop.xlane.xlu0 %2383 }
 0xfc0   : > { %v2386_v20 = vmul.f32 0.03125, %v2384_v19 }
 0xfc2   : > { %v2387_v21 = vsub.f32 %v2381_v17, %v2386_v20 }
 0xfc4   : > { %v2388_v22 = vmul.f32 %v2387_v21, %v2387_v21 }
 0xfc6   : > { %v2389_v23 = vsel %vm447_vm1, %v2388_v22, 0.0 }
 0xfc7   : > { %2390 = vadd.xlane.f32.xlu1 %v2389_v23 }
0x1054   : > { %v2391_v24 = vpop.xlane.xlu1 %2390 }
0x1055   : > { %v2392_v25 = vmul.f32 0.03125, %v2391_v24 }
0x1057   : > { %v2393_v26 = vadd.f32 1e-12, %v2392_v25 }
0x1059   : > { %3006 = vrsqrt.f32 %v2393_v26 }
0x1063   : > { %v3007_v27 = vpop.eup %3006 }
0x1064   : > { %v2395_v28 = vmul.f32 %v3007_v27, %v2387_v21 }
0x1066   : > { %v2403_v31 = vmul.f32 %v2594_v14, %v2395_v28 }
0x1068   : > { %v2411_v32 = vadd.f32 %v2595_v30, %v2403_v31 }
0x106a   : > { %2412 = vst.msk [vmem:[%s417_s29] sm:$0xff] %vm447_vm1, %v2411_v32 }
0x106b   : > { %3021 = shalt.err (!%p3018_p3)
}
0x106c   : > { %s3022_s0 = scalar_lea.hbm %s3561_s1, 128  ;;  %s3026_s28 = scalar_lea.hbm %s3616_s12, 256 }
0x106d   : > { %p3023_p4 = scmp.ne.s32.totalorder %s3561_s1, %s3022_s0  ;;  %p3027_p9 = scmp.lt.u32.totalorder %s3561_s1, %s3616_s12 }
0x106e   : > { %p3028_p10 = scmp.lt.u32.totalorder %s3026_s28, %s3022_s0  ;;  %p3030_p12 = scmp.lt.u32.totalorder %s3022_s0, %s3561_s1 }
0x106f   : > { %p3024_p7 = pnand %p3023_p4, %p3179_p5 }
0x1070   : > { %p3029_p11 = por %p3028_p10, %p3027_p9 }
0x1071   : > { %p3025_p8 = pneg %p3024_p7 }
0x1072   : > { %p3031_p13 = por %p3030_p12, %p3029_p11 }
0x1074   : > { %p3032_p0 = pnand %p3031_p13, %p3025_p8 }
0x1076   : > { %3035 = shalt.err (!%p3032_p0)
}
0x1077   : > { %2948 = dma.vmem_to_hbm [thread:$0]  (%p3179_p5), %s3563_s26, 128, %s3561_s1, %s2414_s17  }
0x1078 PF: > { %p2954_p1 = scmp.ge.s32.totalorder %s3070_s24, 2  ;;  %s2439_s18 = sand.u32 1, %s3058_s21  }
0x1079   : > { %s2440_s25 = scalar_lea.sflag [#allocation3], %s2439_s18 }
0x107a   : > { %p2951_p2 = pnand %p2954_p1, %p3183_p6 }
0x107c   : > { %3053 = dma.done.wait (!%p2951_p2), %s2440_s25, 128  }
0x107d   : > { %3055 = vsyncadd (!%p2951_p2), %s2440_s25, 4294967168  ;;  %s3624_s16 = sld [smem:[#allocation5_spill]]  ;;  %p22_p3 = scmp.ge.s32.totalorder %s3166_s27, 4  }
0x107e   : > { %s3625_s21 = smov %s3062_s22  ;;  %s3626_s22 = smov %s3066_s23 }
0x107f   : > { %s3628_s24 = smov %s3166_s27  ;;  %24 = sbr.rel (!%p22_p3) target bundleno = 6 (0x6), region = 127 }
0x1083   : > { %s3627_s23 = smov %s3624_s16 }
0x1086   :  { %2445 = vsyncpa [#allocation3], 1 }
0x1087   :  { %2447 = vsyncpa [#allocation3 + $0x1], 1 }

</bundles_post_ra>
